<compile_context>
chip_gen: v5e
topology: v5e:2x2
jax: 0.10.0
libtpu: 0.0.40
codegen_flags: <defaults>
</compile_context>

<pallas_src>
import functools

import jax
import jax.numpy as jnp
from jax.experimental import pallas as pl
from jax.experimental.pallas import tpu as pltpu


def _mish(v):
    # Mish(x) = x * tanh(softplus(x))
    return v * jnp.tanh(jax.nn.softplus(v))


def _reduce_fc_kernel(x_ref, w1_ref, w2_ref, scale_ref, sum_acc, max_acc, *,
                      hw_total):
    # x_ref   : (1, C, THW)  one HW tile of one batch element
    # w1_ref  : (Ch, C)      PyTorch nn.Linear(C, Ch).weight  (out, in)
    # w2_ref  : (C, Ch)      PyTorch nn.Linear(Ch, C).weight  (out, in)
    # scale_ref: (1, C, 1)   per-channel attention scale (f32)
    # sum_acc / max_acc: (C, 1) f32 VMEM accumulators
    t = pl.program_id(1)

    @pl.when(t == 0)
    def _init():
        sum_acc[...] = jnp.zeros_like(sum_acc)
        max_acc[...] = jnp.full_like(max_acc, -jnp.inf)

    xc = x_ref[0]  # (C, THW), native dtype (no full-tile upcast)
    sum_acc[...] += jnp.sum(xc.astype(jnp.float32), axis=-1, keepdims=True)
    max_acc[...] = jnp.maximum(
        max_acc[...],
        jnp.max(xc, axis=-1, keepdims=True).astype(jnp.float32))

    @pl.when(t == pl.num_programs(1) - 1)
    def _finalize():
        avg = sum_acc[...] * (1.0 / float(hw_total))            # (C, 1)
        stats = jnp.concatenate([avg, max_acc[...]], axis=-1)   # (C, 2)
        # Fused FC for both pooled vectors, transposed orientation
        # (no .T on activations anywhere):
        #   h^T = W1 @ stats          -> (Ch, 2)
        #   s^T = W2 @ mish(h^T)      -> (C, 2)
        h = jnp.dot(w1_ref[...].astype(jnp.float32), stats,
                    preferred_element_type=jnp.float32)
        h = _mish(h)
        s = jnp.dot(w2_ref[...].astype(jnp.float32), h,
                    preferred_element_type=jnp.float32)
        s = jax.nn.sigmoid(s)
        scale = s[:, 0:1] + s[:, 1:2]                           # (C, 1)
        scale_ref[...] = scale[None].astype(scale_ref.dtype)    # (1, C, 1)


def _apply_kernel(scale_ref, x_ref, o_ref):
    # scale_ref: (1, C, 1); x_ref/o_ref: (1, C, THW)
    o_ref[...] = x_ref[...] * scale_ref[...].astype(x_ref.dtype)


def _pick_hw_tile(hw, c, itemsize):
    """Lane-dense HW tile; block capped to ~2 MiB, tile must divide HW."""
    if hw <= 2048:
        return hw
    budget = 2 * 1024 * 1024
    for t in (2048, 1024, 512, 256, 128):
        if hw % t == 0 and c * t * itemsize <= budget:
            return t
    return hw  # fallback: full-HW block (block == full array is always legal)


def cbam_channel_attention(x_nchw, w1, w2, *, hw_tile=None):
    """CBAM channel attention.

    x_nchw: (B, C, H, W)
    w1:     (C//r, C)   -- first  nn.Linear weight in PyTorch (out, in) layout
    w2:     (C, C//r)   -- second nn.Linear weight in PyTorch (out, in) layout
    """
    B, C, H, W = x_nchw.shape
    HW = H * W
    Ch = w1.shape[0]
    x3 = x_nchw.reshape(B, C, HW)

    if hw_tile is None:
        hw_tile = _pick_hw_tile(HW, C, x_nchw.dtype.itemsize)
    if HW % hw_tile != 0:
        hw_tile = HW
    T = HW // hw_tile

    # Phase 1: pooled stats + fused FC -> per-channel scale (B, C, 1) f32.
    scale = pl.pallas_call(
        functools.partial(_reduce_fc_kernel, hw_total=HW),
        out_shape=jax.ShapeDtypeStruct((B, C, 1), jnp.float32),
        grid_spec=pltpu.PrefetchScalarGridSpec(
            num_scalar_prefetch=0,
            grid=(B, T),
            in_specs=[
                pl.BlockSpec((1, C, hw_tile), lambda b, t: (b, 0, t)),
                pl.BlockSpec((Ch, C), lambda b, t: (0, 0)),
                pl.BlockSpec((C, Ch), lambda b, t: (0, 0)),
            ],
            out_specs=pl.BlockSpec((1, C, 1), lambda b, t: (b, 0, 0)),
            scratch_shapes=[
                pltpu.VMEM((C, 1), jnp.float32),   # running sum
                pltpu.VMEM((C, 1), jnp.float32),   # running max
            ],
        ),
        compiler_params=pltpu.CompilerParams(
            dimension_semantics=("parallel", "arbitrary"),
            vmem_limit_bytes=32 * 1024 * 1024,
        ),
    )(x3, w1, w2)

    # Phase 2: broadcast multiply, fully parallel over (B, HW tiles).
    out3 = pl.pallas_call(
        _apply_kernel,
        out_shape=jax.ShapeDtypeStruct((B, C, HW), x_nchw.dtype),
        grid_spec=pltpu.PrefetchScalarGridSpec(
            num_scalar_prefetch=0,
            grid=(B, T),
            in_specs=[
                pl.BlockSpec((1, C, 1), lambda b, t: (b, 0, 0)),
                pl.BlockSpec((1, C, hw_tile), lambda b, t: (b, 0, t)),
            ],
            out_specs=pl.BlockSpec((1, C, hw_tile), lambda b, t: (b, 0, t)),
        ),
        compiler_params=pltpu.CompilerParams(
            dimension_semantics=("parallel", "parallel"),
            vmem_limit_bytes=32 * 1024 * 1024,
        ),
    )(scale, x3)

    return out3.reshape(B, C, H, W)


def reference_jax(x, w1, w2):
    # Pure-JAX reference matching the PyTorch forward (weights in (out, in)).
    avg = jnp.mean(x, axis=(2, 3))
    mx = jnp.max(x, axis=(2, 3))

    def fc(v):
        h = v @ w1.T
        h = h * jnp.tanh(jax.nn.softplus(h))
        return jax.nn.sigmoid(h @ w2.T)

    scale = fc(avg) + fc(mx)
    return x * scale[:, :, None, None]


if __name__ == "__main__":
    key = jax.random.PRNGKey(0)

    def run_case(B, C, H, W, r, seed, hw_tile=None):
        Ch = max(C // r, 1)
        k = jax.random.fold_in(key, seed)
        kx, k1, k2 = jax.random.split(k, 3)
        x = jax.random.normal(kx, (B, C, H, W), dtype=jnp.float32)
        # PyTorch nn.Linear(in, out).weight has shape (out, in); keep native.
        w1 = jax.random.normal(k1, (Ch, C), dtype=jnp.float32) * 0.1
        w2 = jax.random.normal(k2, (C, Ch), dtype=jnp.float32) * 0.1

        out = jax.block_until_ready(
            cbam_channel_attention(x, w1, w2, hw_tile=hw_tile))
        ref = reference_jax(x, w1, w2)
        assert out.shape == x.shape
        err = float(jnp.max(jnp.abs(out - ref)))
        assert jnp.allclose(out, ref, atol=1e-5, rtol=1e-5), err

    # Single-HW-tile path (auto tile), like CBAM_ChannelAttention(32).
    run_case(2, 32, 16, 16, 16, 1)
    # Multi-tile path: force hw_tile=128 (T=2) to exercise the accumulator.
    run_case(2, 16, 16, 16, 8, 2, hw_tile=128)

    print("KERNEL_OK")
</pallas_src>

<mosaic_0001>
module attributes {stable_mosaic.version = 11 : i64} {
  func.func @_reduce_fc_kernel(%arg0: i32, %arg1: i32, %arg2: memref<1x32x256xf32, #tpu.memory_space<vmem>>, %arg3: memref<2x32xf32, #tpu.memory_space<vmem>>, %arg4: memref<32x2xf32, #tpu.memory_space<vmem>>, %arg5: memref<1x32x1xf32, #tpu.memory_space<vmem>>, %arg6: memref<32x1xf32, #tpu.memory_space<vmem>>, %arg7: memref<32x1xf32, #tpu.memory_space<vmem>>) attributes {dimension_semantics = [#tpu.dimension_semantics<parallel>, #tpu.dimension_semantics<arbitrary>], iteration_bounds = array<i64: 2, 1>, scalar_prefetch = 0 : i64, scratch_operands = 2 : i64, tpu.core_type = #tpu.core_type<tc>, window_params = [{transform_indices = @transform_0, window_bounds = array<i64: 1, 32, 256>}, {pipeline_mode = #tpu.pipeline_mode<synchronous>, transform_indices = @transform_1, window_bounds = array<i64: 2, 32>}, {pipeline_mode = #tpu.pipeline_mode<synchronous>, transform_indices = @transform_2, window_bounds = array<i64: 32, 2>}, {transform_indices = @transform_3, window_bounds = array<i64: 1, 32, 1>}]} {
    %c0_i32 = arith.constant 0 : i32
    %0 = arith.cmpi eq, %arg1, %c0_i32 : i32
    %1 = arith.extui %0 : i1 to i32
    %c0_i32_0 = arith.constant 0 : i32
    %2 = arith.cmpi ne, %1, %c0_i32_0 : i32
    scf.if %2 {
      %cst_14 = arith.constant 0.000000e+00 : f32
      %18 = vector.broadcast %cst_14 : f32 to vector<32x1xf32>
      %c0_15 = arith.constant 0 : index
      %c0_16 = arith.constant 0 : index
      %19 = vector.load %arg6[%c0_15, %c0_16] : memref<32x1xf32, #tpu.memory_space<vmem>>, vector<32x1xf32>
      tpu.vector_store %arg6[%c0_15, %c0_16], %18 {strides = array<i32>} : memref<32x1xf32, #tpu.memory_space<vmem>>, vector<32x1xf32>,
      %cst_17 = arith.constant 0xFF800000 : f32
      %20 = vector.broadcast %cst_17 : f32 to vector<32x1xf32>
      %c0_18 = arith.constant 0 : index
      %c0_19 = arith.constant 0 : index
      %21 = vector.load %arg7[%c0_18, %c0_19] : memref<32x1xf32, #tpu.memory_space<vmem>>, vector<32x1xf32>
      tpu.vector_store %arg7[%c0_18, %c0_19], %20 {strides = array<i32>} : memref<32x1xf32, #tpu.memory_space<vmem>>, vector<32x1xf32>,
    } else {
    }
    %c0 = arith.constant 0 : index
    %c0_1 = arith.constant 0 : index
    %c0_2 = arith.constant 0 : index
    %3 = vector.load %arg2[%c0, %c0_1, %c0_2] : memref<1x32x256xf32, #tpu.memory_space<vmem>>, vector<1x32x256xf32>
    %4 = vector.shape_cast %3 : vector<1x32x256xf32> to vector<32x256xf32>
    %c0_3 = arith.constant 0 : index
    %c0_4 = arith.constant 0 : index
    %5 = vector.load %arg6[%c0_3, %c0_4] : memref<32x1xf32, #tpu.memory_space<vmem>>, vector<32x1xf32>
    %cst = arith.constant dense<0.000000e+00> : vector<32xf32>
    %6 = vector.multi_reduction <add>, %4, %cst [1] : vector<32x256xf32> to vector<32xf32>
    %7 = vector.shape_cast %6 : vector<32xf32> to vector<32x1xf32>
    %8 = arith.addf %5, %7 : vector<32x1xf32>
    %c0_5 = arith.constant 0 : index
    %c0_6 = arith.constant 0 : index
    %9 = vector.load %arg6[%c0_5, %c0_6] : memref<32x1xf32, #tpu.memory_space<vmem>>, vector<32x1xf32>
    tpu.vector_store %arg6[%c0_5, %c0_6], %8 {strides = array<i32>} : memref<32x1xf32, #tpu.memory_space<vmem>>, vector<32x1xf32>,
    %c0_7 = arith.constant 0 : index
    %c0_8 = arith.constant 0 : index
    %10 = vector.load %arg7[%c0_7, %c0_8] : memref<32x1xf32, #tpu.memory_space<vmem>>, vector<32x1xf32>
    %cst_9 = arith.constant dense<0xFF800000> : vector<32xf32>
    %11 = vector.multi_reduction <maximumf>, %4, %cst_9 [1] : vector<32x256xf32> to vector<32xf32>
    %12 = vector.shape_cast %11 : vector<32xf32> to vector<32x1xf32>
    %13 = arith.maximumf %10, %12 : vector<32x1xf32>
    %c0_10 = arith.constant 0 : index
    %c0_11 = arith.constant 0 : index
    %14 = vector.load %arg7[%c0_10, %c0_11] : memref<32x1xf32, #tpu.memory_space<vmem>>, vector<32x1xf32>
    tpu.vector_store %arg7[%c0_10, %c0_11], %13 {strides = array<i32>} : memref<32x1xf32, #tpu.memory_space<vmem>>, vector<32x1xf32>,
    %c0_i32_12 = arith.constant 0 : i32
    %15 = arith.cmpi eq, %arg1, %c0_i32_12 : i32
    %16 = arith.extui %15 : i1 to i32
    %c0_i32_13 = arith.constant 0 : i32
    %17 = arith.cmpi ne, %16, %c0_i32_13 : i32
    scf.if %17 {
      %c0_14 = arith.constant 0 : index
      %c0_15 = arith.constant 0 : index
      %18 = vector.load %arg6[%c0_14, %c0_15] : memref<32x1xf32, #tpu.memory_space<vmem>>, vector<32x1xf32>
      %cst_16 = arith.constant 3.906250e-03 : f32
      %19 = vector.broadcast %cst_16 : f32 to vector<32x1xf32>
      %20 = arith.mulf %18, %19 : vector<32x1xf32>
      %c0_17 = arith.constant 0 : index
      %c0_18 = arith.constant 0 : index
      %21 = vector.load %arg7[%c0_17, %c0_18] : memref<32x1xf32, #tpu.memory_space<vmem>>, vector<32x1xf32>
      %22 = tpu.concatenate %20, %21 in 1 : vector<32x1xf32>, vector<32x1xf32> -> vector<32x2xf32>
      %c0_19 = arith.constant 0 : index
      %c0_20 = arith.constant 0 : index
      %23 = vector.load %arg3[%c0_19, %c0_20] : memref<2x32xf32, #tpu.memory_space<vmem>>, vector<2x32xf32>
      %cst_21 = arith.constant dense<0.000000e+00> : vector<2x2xf32>
      %24 = tpu.matmul %23, %22, %cst_21 {dimension_numbers = #tpu.dot_dimension_numbers<[1], [0], [0], [1], [0, 0, 1, 1], [], []>} : vector<2x32xf32>, vector<32x2xf32>, vector<2x2xf32> -> vector<2x2xf32>
      %cst_22 = arith.constant 0.000000e+00 : f32
      %25 = vector.broadcast %cst_22 : f32 to vector<2x2xf32>
      %26 = arith.maximumf %24, %25 : vector<2x2xf32>
      %27 = vector.broadcast %cst_22 : f32 to vector<2x2xf32>
      %28 = arith.subf %24, %27 : vector<2x2xf32>
      %29 = arith.cmpf one, %28, %28 : vector<2x2xf32>
      %30 = vector.broadcast %cst_22 : f32 to vector<2x2xf32>
      %31 = arith.addf %24, %30 : vector<2x2xf32>
      %32 = math.absf %28 : vector<2x2xf32>
      %cst_23 = arith.constant 0.000000e+00 : f32
      %33 = vector.broadcast %cst_23 : f32 to vector<2x2xf32>
      %34 = arith.subf %33, %32 : vector<2x2xf32>
      %35 = math.exp %34 : vector<2x2xf32>
      %36 = math.log1p %35 : vector<2x2xf32>
      %37 = arith.addf %26, %36 : vector<2x2xf32>
      %38 = arith.select %29, %31, %37 : vector<2x2xi1>, vector<2x2xf32>
      %39 = math.tanh %38 : vector<2x2xf32>
      %40 = arith.mulf %24, %39 : vector<2x2xf32>
      %c0_24 = arith.constant 0 : index
      %c0_25 = arith.constant 0 : index
      %41 = vector.load %arg4[%c0_24, %c0_25] : memref<32x2xf32, #tpu.memory_space<vmem>>, vector<32x2xf32>
      %cst_26 = arith.constant dense<0.000000e+00> : vector<32x2xf32>
      %42 = tpu.matmul %41, %40, %cst_26 {dimension_numbers = #tpu.dot_dimension_numbers<[1], [0], [0], [1], [0, 0, 1, 1], [], []>} : vector<32x2xf32>, vector<2x2xf32>, vector<32x2xf32> -> vector<32x2xf32>
      %43 = arith.negf %42 : vector<32x2xf32>
      %44 = math.exp %43 : vector<32x2xf32>
      %cst_27 = arith.constant 1.000000e+00 : f32
      %45 = vector.broadcast %cst_27 : f32 to vector<32x2xf32>
      %46 = arith.addf %45, %44 : vector<32x2xf32>
      %47 = arith.divf %45, %46 : vector<32x2xf32>
      %48 = vector.extract_strided_slice %47 {offsets = [0, 0], sizes = [32, 1], strides = [1, 1]} : vector<32x2xf32> to vector<32x1xf32>
      %49 = vector.extract_strided_slice %47 {offsets = [0, 1], sizes = [32, 1], strides = [1, 1]} : vector<32x2xf32> to vector<32x1xf32>
      %50 = arith.addf %48, %49 : vector<32x1xf32>
      %51 = vector.shape_cast %50 : vector<32x1xf32> to vector<1x32x1xf32>
      %c0_28 = arith.constant 0 : index
      %c0_29 = arith.constant 0 : index
      %c0_30 = arith.constant 0 : index
      %52 = vector.load %arg5[%c0_28, %c0_29, %c0_30] : memref<1x32x1xf32, #tpu.memory_space<vmem>>, vector<1x32x1xf32>
      tpu.vector_store %arg5[%c0_28, %c0_29, %c0_30], %51 {strides = array<i32>} : memref<1x32x1xf32, #tpu.memory_space<vmem>>, vector<1x32x1xf32>,
    } else {
    }
    return
  }
  func.func @transform_0(%arg0: i32, %arg1: i32) -> (i32, i32, i32) {
    %c0_i32 = arith.constant 0 : i32
    %c0_i32_0 = arith.constant 0 : i32
    return %arg0, %c0_i32, %arg1 : i32, i32, i32
  }
  func.func @transform_1(%arg0: i32, %arg1: i32) -> (i32, i32) {
    %c0_i32 = arith.constant 0 : i32
    %c0_i32_0 = arith.constant 0 : i32
    %c0_i32_1 = arith.constant 0 : i32
    return %c0_i32, %c0_i32_0 : i32, i32
  }
  func.func @transform_2(%arg0: i32, %arg1: i32) -> (i32, i32) {
    %c0_i32 = arith.constant 0 : i32
    %c0_i32_0 = arith.constant 0 : i32
    %c0_i32_1 = arith.constant 0 : i32
    return %c0_i32, %c0_i32_0 : i32, i32
  }
  func.func @transform_3(%arg0: i32, %arg1: i32) -> (i32, i32, i32) {
    %c0_i32 = arith.constant 0 : i32
    %c0_i32_0 = arith.constant 0 : i32
    %c0_i32_1 = arith.constant 0 : i32
    return %arg0, %c0_i32, %c0_i32_0 : i32, i32, i32
  }
}

</mosaic_0001>

<bundles_post_ra>
// kernel: tpu_custom_call.1
= control target key start
LH: loop header
LB: loop body
LE: loop exit
PB: predicated region body
PF: predicated region fallthrough
CT: control target
= control target key end

     0   :  { %8 = vsyncpa [#allocation5], 0  ;;  %s947_s0 = inlined_call_operand.hbm [shape: f32[2,32,256], index: 0, kind: input, shape index: {}]   ;;  %s948_s1 = inlined_call_operand.vmem [shape: f32[2,32], index: 1, kind: input, shape index: {}]   ;;  %s949_s2 = inlined_call_operand.vmem [shape: f32[32,2], index: 2, kind: input, shape index: {}]   ;;  %s950_s3 = inlined_call_operand.vmem [shape: f32[2,32,1], index: 3, kind: output, shape index: {}]  }
   0x1   :  { %10 = vsyncpa [#allocation5 + $0x1], 0  ;;  %s816_s12 = smov 0   ;;  %s818_s13 = smov 0  }
   0x2   :  { %s820_s14 = smov 0   ;;  %s822_s15 = smov 0  }
   0x3   :  { %s824_s16 = smov 0   ;;  %s826_s17 = smov 0  }
   0x4 LB: > { %s588_s18 = sadd.s32 4294967295, %s788_s17   ;;  %s28_s19 = sadd.s32 1, %s784_s16  ;;  %s788_s17 = sphi %s826_s17, %s16_s17   ;;  %s784_s16 = sphi %s824_s16, %s957_s16   ;;  %s780_s15 = sphi %s822_s15, %s956_s15   ;;  %s776_s14 = sphi %s820_s14, %s955_s14   ;;  %s772_s13 = sphi %s818_s13, %s954_s13   ;;  %s768_s12 = sphi %s816_s12, %s953_s12  }
   0x5   : > { %p30_p0 = scmp.ge.s32.totalorder %s28_s19, 2  ;;  %s37_s20 = sadd.s32 1, %s776_s14 }
   0x6   : > { %p44_p1 = scmp.ne.s32.totalorder %s776_s14, %s772_s13  ;;  %p45_p2 = scmp.eq.s32.totalorder %s788_s17, 0 }
   0x7   : > { %s959_s19 = smov (%p30_p0, %s28_s19), 0  ;;  %p50_p4 = scmp.ne.s32.totalorder %s772_s13, %s768_s12 }
   0x8   : > { %p852_p3 = por %p45_p2, %p44_p1  ;;  %s32_s22 = ssub.s32 %s784_s16, %s959_s19 }
   0x9   : > { %p51_p5 = scmp.eq.s32.totalorder %s588_s18, 0  ;;  %p35_p6 = scmp.eq.s32.totalorder %s32_s22, 0 }
   0xa   : > { %p621_p8 = scmp.lt.s32.totalorder %s788_s17, 2  ;;  %s148_s25 = sand.u32 1, %s776_s14  }
   0xb   : > { %p859_p7 = por %p51_p5, %p50_p4  ;;  %s611_s26 = sshll.u32 %s784_s16, 6 }
   0xc   : > { %s865_s24 = scalar_select %p35_p6, %s776_s14, %s37_s20  }
   0xd   : > { %s592_s27 = sshll.u32 %s148_s25, 6  ;;  %s159_s30 = scalar_lea.hbm %s947_s0, %s611_s26 }
   0xe   : > { %s160_s4 = sshll.u32 %s159_s30, 4  ;;  %s152_s5 = scalar_lea.vmem [#allocation4], %s592_s27  ;;  %s161_s4 = int_to_ptr.hbm [resolvable:$true] %s160_s4 }
   0xf   : > { %s162_s6 = sshll.u32 %s152_s5, 4  ;;  %p618_p9 = pnand %p621_p8, %p852_p3  ;;  %s163_s6 = int_to_ptr.vmem [resolvable:$true] %s162_s6 }
  0x10   : > { %p595_p10 = scmp.ge.s32.totalorder %s788_s17, 1  ;;  %p170_p11 = scmp.lt.s32.totalorder %s788_s17, 3 }
  0x11   : > { %s149_s7 = scalar_lea.sflag [#allocation5], %s148_s25  ;;  %s790_s8 = smov 256  }
  0x12   : > { %s791_s9 = smov 16   ;;  %p171_p12 = pnand %p595_p10, %p170_p11 }
  0x13   : > { %620 = dma.hbm_to_vmem [thread:$0]  (!%p618_p9), %s161_s4, 1024, %s163_s6, %s149_s7, %s790_s8, %s790_s8, %s791_s9  }
  0x14   : > { %174 = sbr.rel (%p171_p12) target bundleno = 737 (0x2e1), region = 32  ;;  %s176_s10 = sand.u32 (!%p171_p12), 1, %s772_s13  }
  0x15   : > { %s596_s11 = sshll.u32 (!%p171_p12), %s176_s10, 6  ;;  %s177_s12 = scalar_lea.sflag (!%p171_p12), [#allocation5], %s176_s10 }
  0x16   : > { %s180_s18 = scalar_lea.vmem (!%p171_p12), [#allocation4], %s596_s11 }
  0x19   : > { %763 = dma.done.wait (%p859_p7), %s177_s12, 1024  }
  0x1a   : > { %765 = vsyncadd (%p859_p7), %s177_s12, 4294966272  ;;  %vm214_vm0 = vcmask 7168   ;;  %v792_v0 = vmov -inf   ;;  %v225_v1 = vld [vmem:[%s180_s18 + $0x10] sm:$0xff]  ;;  %v226_v2 = vld [vmem:[%s180_s18 + $0x18] sm:$0xff]  ;;  %v793_v17 = vmov 0.0  }
  0x1b   : > { %220 = vst.msk [vmem:[#allocation3 + $0x8] sm:$0xff] %vm214_vm0, %v792_v0  ;;  %v263_v3 = vmax.f32 %v225_v1, %v226_v2  ;;  %v229_v4 = vld [vmem:[%s180_s18 + $0x30] sm:$0xff]  ;;  %v230_v5 = vld [vmem:[%s180_s18 + $0x38] sm:$0xff]  ;;  %v223_v8 = vld [vmem:[%s180_s18] sm:$0xff]  ;;  %v238_v15 = vadd.f32 %v226_v2, %v225_v1  ;;  %s794_s20 = smov 1   ;;  %vm316_vm1 = vcmask 261120  }
  0x1c   : > { %219 = vst.msk [vmem:[#allocation3] sm:$0xff] %vm214_vm0, %v792_v0  ;;  %v269_v6 = vmax.f32 %v229_v4, %v230_v5  ;;  %v244_v7 = vadd.f32 %v230_v5, %v229_v4  ;;  %v224_v9 = vld [vmem:[%s180_s18 + $0x8] sm:$0xff]  ;;  %v227_v10 = vld [vmem:[%s180_s18 + $0x20] sm:$0xff]  ;;  %vm377_vm4 = vcmask 1041408   ;;  %vm364_vm5 = vcmask 15360   ;;  %s795_s5 = smov 127  }
  0x1d   : > { %221 = vst.msk [vmem:[#allocation3 + $0x10] sm:$0xff] %vm214_vm0, %v792_v0  ;;  %264 = vmax.xlane.f32.xlu1 %v263_v3  ;;  %v228_v11 = vld [vmem:[%s180_s18 + $0x28] sm:$0xff]  ;;  %v260_v12 = vmax.f32 %v223_v8, %v224_v9  ;;  %v235_v16 = vadd.f32 %v224_v9, %v223_v8  ;;  %v315_v1 = vld [vmem:[%s948_s1] sm:$0x3]  ;;  %p205_p13 = scmp.lt.s32.totalorder %s780_s15, 1 }
  0x1e   : > { %222 = vst.msk [vmem:[#allocation3 + $0x18] sm:$0xff] %vm214_vm0, %v792_v0  ;;  %270 = vmax.xlane.f32.xlu0 %v269_v6  ;;  %245 = vadd.xlane.f32.xlu2 %v244_v7  ;;  %v266_v13 = vmax.f32 %v227_v10, %v228_v11  ;;  %v241_v14 = vadd.f32 %v228_v11, %v227_v10 }
  0x1f   : > { %218 = vst.msk [vmem:[#allocation2 + $0x18] sm:$0xff] %vm214_vm0, %v793_v17  ;;  %s961_s15 = smov (!%p205_p13, %s780_s15), 1 }
  0x20   : > { %215 = vst.msk [vmem:[#allocation2] sm:$0xff] %vm214_vm0, %v793_v17  ;;  %s612_s6 = sshll.u32 %s961_s15, 5 }
  0x21   : > { %216 = vst.msk [vmem:[#allocation2 + $0x8] sm:$0xff] %vm214_vm0, %v793_v17  ;;  %s209_s9 = scalar_lea.vmem %s950_s3, %s612_s6 }
  0x22   : > { %217 = vst.msk [vmem:[#allocation2 + $0x10] sm:$0xff] %vm214_vm0, %v793_v17  ;;  %v257_v18 = vld [vmem:[#allocation3 + $0x8] sm:$0xff] }
  0x23   : > { %v256_v27 = vld [vmem:[#allocation3] sm:$0xff] }
  0x24   : > { %v258_v28 = vld [vmem:[#allocation3 + $0x10] sm:$0xff] }
  0x25   : > { %261 = vmax.xlane.f32.xlu1 %v260_v12  ;;  %v259_v19 = vld [vmem:[#allocation3 + $0x18] sm:$0xff] }
  0x26   : > { %267 = vmax.xlane.f32.xlu0 %v266_v13  ;;  %242 = vadd.xlane.f32.xlu2 %v241_v14  ;;  %v234_v20 = vld [vmem:[#allocation2 + $0x18] sm:$0xff] }
  0x27   : > { %v231_v45 = vld [vmem:[#allocation2] sm:$0xff] }
  0x28   : > { %v232_v42 = vld [vmem:[#allocation2 + $0x8] sm:$0xff] }
  0x29   : > { %v233_v29 = vld [vmem:[#allocation2 + $0x10] sm:$0xff] }
  0x2d   : > { %236 = vadd.xlane.f32.xlu1 %v235_v16 }
  0x2e   : > { %239 = vadd.xlane.f32.xlu0 %v238_v15 }
  0x90   : > { %v265_v21 = vpop.xlane.xlu1 %264 }
  0x91   : > { %v273_v22 = vmax.f32 %v257_v18, %v265_v21  ;;  %v271_v23 = vpop.xlane.xlu0 %270  ;;  %v246_v24 = vpop.xlane.xlu2 %245  ;;  %v360_v21 = vld [vmem:[%s949_s2] sm:$0xff] }
  0x92   : > { %v275_v25 = vmax.f32 %v259_v19, %v271_v23  ;;  %v250_v26 = vadd.f32 %v246_v24, %v234_v20  ;;  %v363_v23 = vld [vmem:[%s949_s2 + $0x18] sm:$0xff]  ;;  %v362_v24 = vld [vmem:[%s949_s2 + $0x10] sm:$0xff] }
  0x93   : > { %277 = vst.msk [vmem:[#allocation3 + $0x8] sm:$0xff] %vm214_vm0, %v273_v22  ;;  %v361_v22 = vld [vmem:[%s949_s2 + $0x8] sm:$0xff] }
  0x94   : > { %279 = vst.msk [vmem:[#allocation3 + $0x18] sm:$0xff] %vm214_vm0, %v275_v25 }
  0x95   : > { %255 = vst.msk [vmem:[#allocation2 + $0x18] sm:$0xff] %vm214_vm0, %v250_v26 }
  0x98   : > { %v262_v30 = vpop.xlane.xlu1 %261 }
  0x99   : > { %v272_v31 = vmax.f32 %v256_v27, %v262_v30  ;;  %v268_v32 = vpop.xlane.xlu0 %267  ;;  %v243_v33 = vpop.xlane.xlu2 %242 }
  0x9a   : > { %v274_v34 = vmax.f32 %v258_v28, %v268_v32  ;;  %v249_v35 = vadd.f32 %v243_v33, %v233_v29  ;;  %v292_v38 = vld [vmem:[#allocation3 + $0x8] sm:$0xff] }
  0x9b   : > { %276 = vst.msk [vmem:[#allocation3] sm:$0xff] %vm214_vm0, %v272_v31  ;;  %v294_v36 = vld [vmem:[#allocation3 + $0x18] sm:$0xff] }
  0x9c   : > { %278 = vst.msk [vmem:[#allocation3 + $0x10] sm:$0xff] %vm214_vm0, %v274_v34  ;;  %v286_v48 = vld [vmem:[#allocation2 + $0x18] sm:$0xff] }
  0x9d   : > { %254 = vst.msk [vmem:[#allocation2 + $0x10] sm:$0xff] %vm214_vm0, %v249_v35  ;;  %v290_v50 = vmul.f32 0.00390625, %v286_v48 }
  0xa0   : > { %v237_v46 = vpop.xlane.xlu1 %236 }
  0xa1   : > { %v240_v43 = vpop.xlane.xlu0 %239  ;;  %v247_v47 = vadd.f32 %v237_v46, %v231_v45 }
  0xa2   : > { %v291_v37 = vld [vmem:[#allocation3] sm:$0xff]  ;;  %v248_v44 = vadd.f32 %v240_v43, %v232_v42 }
  0xa3   : > { %v681_v39 = vpack.i.bf16 %v291_v37, %v292_v38  ;;  %v293_v40 = vld [vmem:[#allocation3 + $0x10] sm:$0xff]  ;;  %252 = vst.msk [vmem:[#allocation2] sm:$0xff] %vm214_vm0, %v247_v47 }
  0xa4   : > { %v676_v41 = vpack.i.bf16 %v293_v40, %v294_v36  ;;  %253 = vst.msk [vmem:[#allocation2 + $0x8] sm:$0xff] %vm214_vm0, %v248_v44  ;;  %v285_v49 = vld [vmem:[#allocation2 + $0x10] sm:$0xff] }
  0xa5   : > { %682 = vrot.lane.b32.xlu0 %v681_v39, %s794_s20  ;;  %v289_v51 = vmul.f32 0.00390625, %v285_v49 }
  0xa6   : > { %677 = vrot.lane.b32.xlu2 %v676_v41, %s794_s20 }
  0xaa   : > { %v283_v58 = vld [vmem:[#allocation2] sm:$0xff] }
  0xab   : > { %v284_v57 = vld [vmem:[#allocation2 + $0x8] sm:$0xff]  ;;  %v287_v63 = vmul.f32 0.00390625, %v283_v58 }
  0xac   : > { %v288_v62 = vmul.f32 0.00390625, %v284_v57 }
 0x100   : > { %v678_v52 = vpop.permute.xlu2 %677 }
 0x101   : > { %v680_v53 = vunpack.i.h.bf16 %v678_v52  ;;  %v679_v54 = vunpack.i.l.bf16 %v678_v52 }
 0x103   : > { %v314_v55 = vsel %vm214_vm0, %v290_v50, %v679_v54  ;;  %v313_v56 = vsel %vm214_vm0, %v289_v51, %v680_v53 }
 0x104   : > { %332 = vmatpush.msra.mxu0 %v314_v55 }
 0x106   : > { %333 = vmatpush.msra.mxu0 %v313_v56 }
 0x117   : > { %v683_v59 = vpop.permute.xlu0 %682 }
 0x118   : > { %v685_v60 = vunpack.i.h.bf16 %v683_v59  ;;  %v684_v61 = vunpack.i.l.bf16 %v683_v59 }
 0x11a   : > { %v312_v0 = vsel %vm214_vm0, %v288_v62, %v684_v61  ;;  %v311_v2 = vsel %vm214_vm0, %v287_v63, %v685_v60 }
 0x11b   : > { %334 = vmatpush.msra.mxu0 %v312_v0 }
 0x11d   : > { %335 = vmatpush.msra.mxu0 %v311_v2 }
 0x11e   : > { %599 = vmatmul.msk.f32.vlgmr.msra.gmra.mxu0 %vm316_vm1, %v315_v1 }
 0x19b   : > { %v337_v3 = vpop.f32.mrf.mxu0 }
 0x19c   : > { %v343_v4 = vand.u32 2147483647, %v337_v3  ;;  %v340_v15 = vmax.f32 %v337_v3, 0.0  ;;  %vm341_vm3 = vcmp.ne.f32.partialorder %v337_v3, %v337_v3 }
 0x19e   : > { %v344_v5 = vsub.f32 0.0, %v343_v4 }
 0x1a0   : > { %v345_v6 = vmul.f32 1.442695, %v344_v5 }
 0x1a2   : > { %686 = vpow2.f32 %v345_v6 }
 0x1a8   : > { %v687_v7 = vpop.eup %686 }
 0x1a9   : > { %v347_v8 = vadd.f32 1.0, %v687_v7  ;;  %v350_v9 = vmul.f32 -0.5, %v687_v7  ;;  %v353_v11 = vand.u32 2147483647, %v687_v7 }
 0x1ab   : > { %688 = vlog2.f32 %v347_v8  ;;  %v351_v10 = vadd.f32 1.0, %v350_v9  ;;  %vm354_vm2 = vcmp.lt.f32.partialorder %v353_v11, 0.0004427343 }
 0x1ad   : > { %v352_v14 = vmul.f32 %v687_v7, %v351_v10 }
 0x1b1   : > { %v689_v12 = vpop.eup %688 }
 0x1b2   : > { %v349_v13 = vmul.f32 0.6931472, %v689_v12 }
 0x1b4   : > { %v355_v16 = vsel %vm354_vm2, %v352_v14, %v349_v13 }
 0x1b5   : > { %v356_v17 = vadd.f32 %v355_v16, %v340_v15 }
 0x1b7   : > { %v357_v18 = vsel %vm341_vm3, %v337_v3, %v356_v17 }
 0x1b8   : > { %690 = vtanh.f32 %v357_v18 }
 0x1be   : > { %v691_v19 = vpop.eup %690 }
 0x1bf   : > { %v359_v20 = vmul.f32 %v691_v19, %v337_v3 }
 0x1c1   : > { %600 = vmatpush.msk.msra.mxu1 %vm377_vm4, %v359_v20  ;;  %613 = vmatpush.msk.msra.mxu2 %vm377_vm4, %v359_v20 }
 0x1c2   : > { %614 = vmatpush.msk.msra.mxu3 %vm377_vm4, %v359_v20  ;;  %601 = vmatmul.msk.f32.vlgmr.msra.gmra.mxu1 %vm364_vm5, %v360_v21 }
 0x1c3   : > { %602 = vmatmul.msk.f32.vlgmr.msra.gmra.mxu2 %vm364_vm5, %v361_v22  ;;  %604 = vmatmul.msk.f32.vlgmr.msra.gmra.mxu3 %vm364_vm5, %v363_v23 }
 0x1cb   : > { %603 = vmatmul.msk.f32.gmra.mxu2 %vm364_vm5, %v362_v24 }
 0x23f   : > { %v398_v25 = vpop.f32.mrf.mxu1 }
 0x240   : > { %v605_v26 = vmul.f32 -1.442695, %v398_v25 }
 0x242   : > { %692 = vpow2.f32 %v605_v26 }
 0x246   : > { %v401_v27 = vpop.f32.mrf.mxu2  ;;  %v407_v28 = vpop.f32.mrf.mxu3 }
 0x247   : > { %v606_v29 = vmul.f32 -1.442695, %v401_v27  ;;  %v608_v30 = vmul.f32 -1.442695, %v407_v28 }
 0x248   : > { %v693_v31 = vpop.eup %692 }
 0x249   : > { %v422_v32 = vadd.f32 1.0, %v693_v31  ;;  %694 = vpow2.f32 %v606_v29 }
 0x24a   : > { %696 = vpow2.f32 %v608_v30 }
 0x24b   : > { %698 = vrcp.f32 %v422_v32  ;;  %v437_v41 = vand.u32 2147483648, %v422_v32  ;;  %vm431_vm6 = vweird.f32 %v422_v32  ;;  %v435_v43 = vand.u32 2147483647, %v422_v32 }
 0x24d   : > { %v438_v46 = vor.u32 1.1754944e-38, %v437_v41  ;;  %vm436_vm9 = vcmp.eq.f32.partialorder %v435_v43, 8.507059e+37 }
 0x24e   : > { %v404_v33 = vpop.f32.mrf.mxu2 }
 0x24f   : > { %v695_v34 = vpop.eup %694  ;;  %v607_v35 = vmul.f32 -1.442695, %v404_v33 }
 0x250   : > { %v697_v36 = vpop.eup %696  ;;  %v423_v37 = vadd.f32 1.0, %v695_v34 }
 0x251   : > { %v699_v38 = vpop.eup %698  ;;  %700 = vpow2.f32 %v607_v35  ;;  %v425_v39 = vadd.f32 1.0, %v697_v36 }
 0x252   : > { %702 = vrcp.f32 %v423_v37  ;;  %v427_v40 = vmul.f32 %v699_v38, %v422_v32  ;;  %vm432_vm7 = vweird.f32 %v699_v38  ;;  %v452_v56 = vand.u32 2147483648, %v423_v37 }
 0x253   : > { %704 = vrcp.f32 %v425_v39  ;;  %vm433_vm8 = vmor %vm431_vm6, %vm432_vm7  ;;  %v450_v59 = vand.u32 2147483647, %v423_v37  ;;  %vm446_vm11 = vweird.f32 %v423_v37  ;;  %vm476_vm12 = vweird.f32 %v425_v39 }
 0x254   : > { %v428_v42 = vsub.f32 1.0, %v427_v40  ;;  %v453_v63 = vor.u32 1.1754944e-38, %v452_v56  ;;  %v480_v0 = vand.u32 2147483647, %v425_v39  ;;  %v482_v1 = vand.u32 2147483648, %v425_v39 }
 0x255   : > { %vm451_vm15 = vcmp.eq.f32.partialorder %v450_v59, 8.507059e+37 }
 0x256   : > { %v429_v44 = vmul.f32 %v699_v38, %v428_v42  ;;  %vm481_vm2 = vcmp.eq.f32.partialorder %v480_v0, 8.507059e+37  ;;  %v483_v7 = vor.u32 1.1754944e-38, %v482_v1 }
 0x257   : > { %v701_v45 = vpop.eup %700 }
 0x258   : > { %v703_v47 = vpop.eup %702  ;;  %v424_v48 = vadd.f32 1.0, %v701_v45  ;;  %v430_v49 = vadd.f32 %v699_v38, %v429_v44 }
 0x259   : > { %v705_v50 = vpop.eup %704  ;;  %v442_v51 = vmul.f32 %v703_v47, %v423_v37  ;;  %vm447_vm10 = vweird.f32 %v703_v47 }
 0x25a   : > { %706 = vrcp.f32 %v424_v48  ;;  %v434_v52 = vsel %vm433_vm8, %v699_v38, %v430_v49  ;;  %v472_v53 = vmul.f32 %v705_v50, %v425_v39  ;;  %vm477_vm13 = vweird.f32 %v705_v50  ;;  %vm448_vm14 = vmor %vm446_vm11, %vm447_vm10 }
 0x25b   : > { %v439_v54 = vsel %vm436_vm9, %v438_v46, %v434_v52  ;;  %v443_v55 = vsub.f32 1.0, %v442_v51  ;;  %vm478_vm1 = vmor %vm476_vm12, %vm477_vm13  ;;  %v467_v8 = vand.u32 2147483648, %v424_v48  ;;  %v465_v11 = vand.u32 2147483647, %v424_v48 }
 0x25c   : > { %490 = vrot.lane.b32.xlu1 %v439_v54, %s795_s5  ;;  %v473_v57 = vsub.f32 1.0, %v472_v53  ;;  %vm461_vm4 = vweird.f32 %v424_v48 }
 0x25d   : > { %v444_v58 = vmul.f32 %v703_v47, %v443_v55  ;;  %v468_v14 = vor.u32 1.1754944e-38, %v467_v8  ;;  %vm466_vm6 = vcmp.eq.f32.partialorder %v465_v11, 8.507059e+37 }
 0x25e   : > { %v474_v60 = vmul.f32 %v705_v50, %v473_v57 }
 0x25f   : > { %v445_v61 = vadd.f32 %v703_v47, %v444_v58 }
 0x260   : > { %v707_v62 = vpop.eup %706  ;;  %v475_v3 = vadd.f32 %v705_v50, %v474_v60 }
 0x261   : > { %v449_v2 = vsel %vm448_vm14, %v703_v47, %v445_v61  ;;  %v457_v4 = vmul.f32 %v707_v62, %v424_v48  ;;  %vm462_vm3 = vweird.f32 %v707_v62 }
 0x262   : > { %v454_v5 = vsel %vm451_vm15, %v453_v63, %v449_v2  ;;  %v479_v9 = vsel %vm478_vm1, %v705_v50, %v475_v3  ;;  %vm463_vm5 = vmor %vm461_vm4, %vm462_vm3 }
 0x263   : > { %492 = vrot.lane.b32.xlu2 %v454_v5, %s795_s5  ;;  %v458_v6 = vsub.f32 1.0, %v457_v4  ;;  %v484_v13 = vsel %vm481_vm2, %v483_v7, %v479_v9 }
 0x265   : > { %v459_v10 = vmul.f32 %v707_v62, %v458_v6 }
 0x267   : > { %v460_v12 = vadd.f32 %v707_v62, %v459_v10 }
 0x269   : > { %v464_v15 = vsel %vm463_vm5, %v707_v62, %v460_v12 }
 0x26a   : > { %v469_v16 = vsel %vm466_vm6, %v468_v14, %v464_v15 }
 0x26b   : > { %496 = vrot.lane.b32.xlu2 %v484_v13, %s795_s5  ;;  %494 = vrot.lane.b32.xlu0 %v469_v16, %s795_s5 }
 0x2bd   : > { %v493_v17 = vpop.permute.xlu2 %492 }
 0x2be   : > { %v503_v18 = vadd.f32 %v493_v17, %v454_v5 }
 0x2c0   : > { %507 = vst.msk [vmem:[%s209_s9 + $0x8] sm:$0xff] %vm214_vm0, %v503_v18 }
 0x2c5   : > { %v497_v19 = vpop.permute.xlu2 %496 }
 0x2c6   : > { %v505_v20 = vadd.f32 %v497_v19, %v484_v13 }
 0x2c8   : > { %509 = vst.msk [vmem:[%s209_s9 + $0x18] sm:$0xff] %vm214_vm0, %v505_v20 }
 0x2ce   : > { %v491_v21 = vpop.permute.xlu1 %490 }
 0x2cf   : > { %v502_v22 = vadd.f32 %v491_v21, %v439_v54 }
 0x2d1   : > { %506 = vst.msk [vmem:[%s209_s9] sm:$0xff] %vm214_vm0, %v502_v22 }
 0x2dd   : > { %v495_v23 = vpop.permute.xlu0 %494 }
 0x2de   : > { %v504_v24 = vadd.f32 %v495_v23, %v469_v16 }
 0x2e0   : > { %508 = vst.msk [vmem:[%s209_s9 + $0x10] sm:$0xff] %vm214_vm0, %v504_v24 }
 0x2e1 PF: > { %s16_s17 = sadd.s32 1, %s788_s17   ;;  %s953_s12 = smov %s772_s13 }
 0x2e2   : > { %p13_p0 = scmp.ge.s32.totalorder %s16_s17, 4   ;;  %s954_s13 = smov %s776_s14 }
 0x2e3   : > { %s955_s14 = smov %s865_s24  ;;  %s956_s15 = smov %s784_s16 }
 0x2e4   : > { %s957_s16 = smov %s959_s19  ;;  %15 = sbr.rel (!%p13_p0) target bundleno = 4 (0x4), region = 80 }
 0x2e9   :  { %531 = vsyncpa [#allocation5], 1 }
 0x2ea   :  { %533 = vsyncpa [#allocation5 + $0x1], 1 }

</bundles_post_ra>
